<compile_context>
chip_gen: v5e
topology: v5e:2x2
jax: 0.10.0
libtpu: 0.0.40
codegen_flags: <defaults>
</compile_context>

<pallas_src>
import functools

import jax
import jax.numpy as jnp
from jax import lax
from jax.experimental import pallas as pl
from jax.experimental.pallas import tpu as pltpu

EPS = 1e-5  # nn.BatchNorm2d default eps


def _round_up(x, n):
    return -(-x // n) * n


def _conv_stats_kernel(taps_ref, w_ref, b_ref, y_ref, part_ref,
                       *, tm, m_valid, masked):
    """One M-tile: conv (single K=9*Cin matmul) + bias, plus BN partial sums."""
    y = jnp.dot(taps_ref[...], w_ref[...], preferred_element_type=jnp.float32)
    y = y + b_ref[...]                              # (tm, C_pad)
    y_ref[...] = y

    if masked:
        # Rows beyond the real M (zero-padded taps) must not pollute BN stats.
        row0 = pl.program_id(0) * tm
        rows = row0 + lax.broadcasted_iota(jnp.int32, (tm, 1), 0)
        valid = rows < m_valid
        ys = jnp.where(valid, y, 0.0)
        ysq = jnp.where(valid, y * y, 0.0)
    else:
        ys = y
        ysq = y * y

    s = jnp.sum(ys, axis=0, keepdims=True)          # (1, C_pad)
    ss = jnp.sum(ysq, axis=0, keepdims=True)        # (1, C_pad)
    part_ref[...] = jnp.concatenate([s, ss], axis=0)[None, :, :]


def _bn_relu_kernel(y_ref, ss_ref, o_ref):
    """One M-tile: y * scale + shift, then ReLU (lane-dense last dim)."""
    scale = ss_ref[0:1, :]
    shift = ss_ref[1:2, :]
    o_ref[...] = jnp.maximum(y_ref[...] * scale + shift, 0.0)


def block_qn_forward(x_nchw, weight_hwio, bias, gamma, beta, std=1, tm=512):
    """weight_hwio: (3, 3, Cin, Cout). Returns NCHW output (f32)."""
    N, Cin, H, W = x_nchw.shape
    KH = KW = 3
    Cout = weight_hwio.shape[-1]
    H_out = (H + 2 - KH) // std + 1
    W_out = (W + 2 - KW) // std + 1
    M = N * H_out * W_out
    K = KH * KW * Cin

    # ---- padding / tiling decisions -------------------------------------
    c_pad = _round_up(Cout, 128)                    # lane-dense channel dim
    tm = min(tm, _round_up(M, 8))                   # M-tile rows (mult. of 8)
    tm = _round_up(tm, 8)
    m_pad = _round_up(M, tm)
    num_tiles = m_pad // tm

    # ---- glue: NCHW -> NHWC, pad, im2col as (M, 9*Cin) -------------------
    x = jnp.transpose(x_nchw, (0, 2, 3, 1)).astype(jnp.float32)
    xp = jnp.pad(x, ((0, 0), (1, 1), (1, 1), (0, 0)))
    cols = []
    for kh in range(KH):
        for kw in range(KW):
            tap = xp[:,
                     kh:kh + (H_out - 1) * std + 1:std,
                     kw:kw + (W_out - 1) * std + 1:std,
                     :]
            cols.append(tap.reshape(M, Cin))
    taps = jnp.concatenate(cols, axis=-1)           # (M, 9*Cin), matches w order
    taps = jnp.pad(taps, ((0, m_pad - M), (0, 0)))  # (m_pad, K)

    w = weight_hwio.reshape(K, Cout).astype(jnp.float32)
    w = jnp.pad(w, ((0, 0), (0, c_pad - Cout)))                     # (K, c_pad)
    bias_p = jnp.pad(bias.astype(jnp.float32), (0, c_pad - Cout)).reshape(1, c_pad)
    gamma_p = jnp.pad(gamma.astype(jnp.float32), (0, c_pad - Cout))  # pad=0 -> out=0
    beta_p = jnp.pad(beta.astype(jnp.float32), (0, c_pad - Cout))

    # ---- pass 1: conv + bias + per-tile BN partial sums -------------------
    kernel_a = functools.partial(_conv_stats_kernel, tm=tm, m_valid=M,
                                 masked=(m_pad != M))
    y_pad, partials = pl.pallas_call(
        kernel_a,
        out_shape=(
            jax.ShapeDtypeStruct((m_pad, c_pad), jnp.float32),
            jax.ShapeDtypeStruct((num_tiles, 2, c_pad), jnp.float32),
        ),
        grid_spec=pltpu.PrefetchScalarGridSpec(
            num_scalar_prefetch=0,
            grid=(num_tiles,),
            in_specs=[
                pl.BlockSpec((tm, K), lambda i: (i, 0)),         # taps tile
                pl.BlockSpec((K, c_pad), lambda i: (0, 0)),      # full weights
                pl.BlockSpec((1, c_pad), lambda i: (0, 0)),      # bias
            ],
            out_specs=(
                pl.BlockSpec((tm, c_pad), lambda i: (i, 0)),     # y tile
                pl.BlockSpec((1, 2, c_pad), lambda i: (i, 0, 0)),  # partial stats
            ),
        ),
        compiler_params=pltpu.CompilerParams(
            dimension_semantics=("parallel",)),
    )(taps, w, bias_p)

    # ---- fold partials -> per-channel scale/shift (tiny, plain JAX) -------
    sums = jnp.sum(partials[:, 0, :], axis=0)        # (c_pad,)
    sumsq = jnp.sum(partials[:, 1, :], axis=0)
    mean = sums / M
    var = sumsq / M - mean * mean                    # biased variance
    invstd = lax.rsqrt(var + EPS)
    scale = gamma_p * invstd
    shift = beta_p - mean * scale
    scale_shift = jnp.stack([scale, shift], axis=0)  # (2, c_pad)

    # ---- pass 2: normalize + affine + ReLU --------------------------------
    out_pad = pl.pallas_call(
        _bn_relu_kernel,
        out_shape=jax.ShapeDtypeStruct((m_pad, c_pad), jnp.float32),
        grid_spec=pltpu.PrefetchScalarGridSpec(
            num_scalar_prefetch=0,
            grid=(num_tiles,),
            in_specs=[
                pl.BlockSpec((tm, c_pad), lambda i: (i, 0)),
                pl.BlockSpec((2, c_pad), lambda i: (0, 0)),
            ],
            out_specs=pl.BlockSpec((tm, c_pad), lambda i: (i, 0)),
        ),
        compiler_params=pltpu.CompilerParams(
            dimension_semantics=("parallel",)),
    )(y_pad, scale_shift)

    out = out_pad[:M, :Cout].reshape(N, H_out, W_out, Cout)
    return jnp.transpose(out, (0, 3, 1, 2))          # back to NCHW


def block_qn_reference(x_nchw, weight_hwio, bias, gamma, beta, std=1):
    """Pure-JAX reference matching PyTorch BlockQN (BatchNorm2d, training mode)."""
    w_oihw = jnp.transpose(weight_hwio, (3, 2, 0, 1))
    y = lax.conv_general_dilated(
        x_nchw, w_oihw, window_strides=(std, std),
        padding=((1, 1), (1, 1)),
        dimension_numbers=("NCHW", "OIHW", "NCHW"))
    y = y + bias.reshape(1, -1, 1, 1)
    mean = jnp.mean(y, axis=(0, 2, 3), keepdims=True)
    var = jnp.mean((y - mean) ** 2, axis=(0, 2, 3), keepdims=True)
    y = (y - mean) * lax.rsqrt(var + EPS)
    y = y * gamma.reshape(1, -1, 1, 1) + beta.reshape(1, -1, 1, 1)
    return jnp.maximum(y, 0.0)


if __name__ == "__main__":
    # BlockQN(in_size=4, out_size=8, std=1, layer_norm=0)
    N, Cin, H, W = 2, 4, 16, 16
    Cout = 8
    std = 1

    key = jax.random.PRNGKey(0)
    kx, kw, kb = jax.random.split(key, 3)
    x = jax.random.normal(kx, (N, Cin, H, W), dtype=jnp.float32)
    weight = jax.random.normal(kw, (3, 3, Cin, Cout), dtype=jnp.float32) * 0.1
    bias = jax.random.normal(kb, (Cout,), dtype=jnp.float32) * 0.1
    gamma = jnp.ones((Cout,), dtype=jnp.float32)   # BatchNorm2d init: weight = 1
    beta = jnp.zeros((Cout,), dtype=jnp.float32)   # BatchNorm2d init: bias = 0

    # tm=256 -> 2 M-tiles at this size, exercising the cross-tile BN stats path.
    out = block_qn_forward(x, weight, bias, gamma, beta, std=std, tm=256)
    out = jax.block_until_ready(out)

    ref = jax.block_until_ready(
        block_qn_reference(x, weight, bias, gamma, beta, std=std))
    assert out.shape == ref.shape == (N, Cout, H, W)
    assert jnp.allclose(out, ref, atol=1e-4, rtol=1e-4), \
        f"max abs err {float(jnp.max(jnp.abs(out - ref)))}"

    print("KERNEL_OK")
</pallas_src>

<mosaic_0001>
module attributes {stable_mosaic.version = 11 : i64} {
  func.func @_conv_stats_kernel(%arg0: i32, %arg1: memref<256x36xf32, #tpu.memory_space<vmem>>, %arg2: memref<36x128xf32, #tpu.memory_space<vmem>>, %arg3: memref<1x128xf32, #tpu.memory_space<vmem>>, %arg4: memref<256x128xf32, #tpu.memory_space<vmem>>, %arg5: memref<1x2x128xf32, #tpu.memory_space<vmem>>) attributes {dimension_semantics = [#tpu.dimension_semantics<parallel>], iteration_bounds = array<i64: 2>, scalar_prefetch = 0 : i64, scratch_operands = 0 : i64, tpu.core_type = #tpu.core_type<tc>, window_params = [{transform_indices = @transform_0, window_bounds = array<i64: 256, 36>}, {pipeline_mode = #tpu.pipeline_mode<synchronous>, transform_indices = @transform_1, window_bounds = array<i64: 36, 128>}, {pipeline_mode = #tpu.pipeline_mode<synchronous>, transform_indices = @transform_2, window_bounds = array<i64: 1, 128>}, {transform_indices = @transform_3, window_bounds = array<i64: 256, 128>}, {transform_indices = @transform_4, window_bounds = array<i64: 1, 2, 128>}]} {
    %c0 = arith.constant 0 : index
    %c0_0 = arith.constant 0 : index
    %0 = vector.load %arg1[%c0, %c0_0] : memref<256x36xf32, #tpu.memory_space<vmem>>, vector<256x36xf32>
    %c0_1 = arith.constant 0 : index
    %c0_2 = arith.constant 0 : index
    %1 = vector.load %arg2[%c0_1, %c0_2] : memref<36x128xf32, #tpu.memory_space<vmem>>, vector<36x128xf32>
    %cst = arith.constant dense<0.000000e+00> : vector<256x128xf32>
    %2 = tpu.matmul %0, %1, %cst {dimension_numbers = #tpu.dot_dimension_numbers<[1], [0], [0], [1], [0, 0, 1, 1], [], []>} : vector<256x36xf32>, vector<36x128xf32>, vector<256x128xf32> -> vector<256x128xf32>
    %c0_3 = arith.constant 0 : index
    %c0_4 = arith.constant 0 : index
    %3 = vector.load %arg3[%c0_3, %c0_4] : memref<1x128xf32, #tpu.memory_space<vmem>>, vector<1x128xf32>
    %4 = vector.broadcast %3 : vector<1x128xf32> to vector<256x128xf32>
    %5 = arith.addf %2, %4 : vector<256x128xf32>
    %c0_5 = arith.constant 0 : index
    %c0_6 = arith.constant 0 : index
    %6 = vector.load %arg4[%c0_5, %c0_6] : memref<256x128xf32, #tpu.memory_space<vmem>>, vector<256x128xf32>
    tpu.vector_store %arg4[%c0_5, %c0_6], %5 {strides = array<i32>} : memref<256x128xf32, #tpu.memory_space<vmem>>, vector<256x128xf32>,
    %7 = arith.mulf %5, %5 : vector<256x128xf32>
    %cst_7 = arith.constant dense<0.000000e+00> : vector<128xf32>
    %8 = vector.multi_reduction <add>, %5, %cst_7 [0] : vector<256x128xf32> to vector<128xf32>
    %9 = vector.shape_cast %8 : vector<128xf32> to vector<1x128xf32>
    %cst_8 = arith.constant dense<0.000000e+00> : vector<128xf32>
    %10 = vector.multi_reduction <add>, %7, %cst_8 [0] : vector<256x128xf32> to vector<128xf32>
    %11 = vector.shape_cast %10 : vector<128xf32> to vector<1x128xf32>
    %12 = tpu.concatenate %9, %11 in 0 : vector<1x128xf32>, vector<1x128xf32> -> vector<2x128xf32>
    %13 = vector.shape_cast %12 : vector<2x128xf32> to vector<1x2x128xf32>
    %c0_9 = arith.constant 0 : index
    %c0_10 = arith.constant 0 : index
    %c0_11 = arith.constant 0 : index
    %14 = vector.load %arg5[%c0_9, %c0_10, %c0_11] : memref<1x2x128xf32, #tpu.memory_space<vmem>>, vector<1x2x128xf32>
    tpu.vector_store %arg5[%c0_9, %c0_10, %c0_11], %13 {strides = array<i32>} : memref<1x2x128xf32, #tpu.memory_space<vmem>>, vector<1x2x128xf32>,
    return
  }
  func.func @transform_0(%arg0: i32) -> (i32, i32) {
    %c0_i32 = arith.constant 0 : i32
    %c0_i32_0 = arith.constant 0 : i32
    return %arg0, %c0_i32 : i32, i32
  }
  func.func @transform_1(%arg0: i32) -> (i32, i32) {
    %c0_i32 = arith.constant 0 : i32
    %c0_i32_0 = arith.constant 0 : i32
    %c0_i32_1 = arith.constant 0 : i32
    return %c0_i32, %c0_i32_0 : i32, i32
  }
  func.func @transform_2(%arg0: i32) -> (i32, i32) {
    %c0_i32 = arith.constant 0 : i32
    %c0_i32_0 = arith.constant 0 : i32
    %c0_i32_1 = arith.constant 0 : i32
    return %c0_i32, %c0_i32_0 : i32, i32
  }
  func.func @transform_3(%arg0: i32) -> (i32, i32) {
    %c0_i32 = arith.constant 0 : i32
    %c0_i32_0 = arith.constant 0 : i32
    return %arg0, %c0_i32 : i32, i32
  }
  func.func @transform_4(%arg0: i32) -> (i32, i32, i32) {
    %c0_i32 = arith.constant 0 : i32
    %c0_i32_0 = arith.constant 0 : i32
    %c0_i32_1 = arith.constant 0 : i32
    return %arg0, %c0_i32, %c0_i32_0 : i32, i32, i32
  }
}

</mosaic_0001>

<bundles_post_ra>
// kernel: tpu_custom_call.1
= control target key start
LH: loop header
LB: loop body
LE: loop exit
PB: predicated region body
PF: predicated region fallthrough
CT: control target
= control target key end

     0   :  { %10 = vsyncpa [#allocation3], 0  ;;  %s1371_s0 = inlined_call_operand.vmem [shape: f32[512,36], index: 0, kind: input, shape index: {}]   ;;  %s1372_s1 = inlined_call_operand.vmem [shape: f32[36,128], index: 1, kind: input, shape index: {}]   ;;  %s1373_s2 = inlined_call_operand.vmem [shape: f32[1,128], index: 2, kind: input, shape index: {}]   ;;  %s1374_s3 = inlined_call_operand.hbm [shape: f32[512,128], index: 3, kind: output, shape index: {0}]   ;;  %s1375_s4 = inlined_call_operand.hbm [shape: f32[2,2,128], index: 4, kind: output, shape index: {1}]  }
   0x1   :  { %12 = vsyncpa [#allocation3 + $0x1], 0 }
   0x2   :  { %13 = vsyncpa [#allocation5], 0 }
   0x3   :  { %15 = vsyncpa [#allocation5 + $0x1], 0  ;;  %s970_s15 = smov 0   ;;  %s972_s16 = smov 0  }
   0x4   :  { %s974_s17 = smov 0   ;;  %s976_s18 = smov 0  }
   0x5 LB: > { %s991_s19 = sadd.s32 4294967295, %s941_s18   ;;  %s736_s20 = sadd.s32 4294967294, %s941_s18   ;;  %s941_s18 = sphi %s976_s18, %s1381_s18   ;;  %s937_s17 = sphi %s974_s17, %s1380_s17   ;;  %s933_s16 = sphi %s972_s16, %s1379_s16   ;;  %s929_s15 = sphi %s970_s15, %s1378_s15  }
   0x6   : > { %s995_s21 = sadd.s32 1, %s941_s18   ;;  %s96_s22 = sadd.s32 1, %s937_s17 }
   0x7   : > { %s93_s23 = ssub.s32 %s941_s18, %s995_s21  ;;  %p106_p0 = scmp.ne.s32.totalorder %s937_s17, %s933_s16 }
   0x8   : > { %p94_p1 = scmp.eq.s32.totalorder %s93_s23, 0  ;;  %p107_p2 = scmp.eq.s32.totalorder %s991_s19, 1 }
   0x9   : > { %p112_p3 = scmp.ne.s32.totalorder %s933_s16, %s929_s15  ;;  %p113_p4 = scmp.eq.s32.totalorder %s736_s20, 1 }
   0xa   : > { %s1006_s24 = scalar_select %p94_p1, %s937_s17, %s96_s22  }
   0xb   : > { %p1008_p5 = por %p107_p2, %p106_p0  ;;  %p1012_p6 = por %p113_p4, %p112_p3 }
   0xc   : > { %p739_p7 = scmp.ge.s32.totalorder %s941_s18, 1  ;;  %p172_p8 = scmp.lt.s32.totalorder %s941_s18, 3 }
   0xe   : > { %p173_p9 = pnand %p739_p7, %p172_p8 }
   0xf   : > { %s742_s5 = sshll.u32 (!%p173_p9), %s991_s19, 5  ;;  %s1104_s22 = sand.u32 (!%p173_p9), 1, %s933_s16  }
  0x10   : > { %176 = sbr.rel (%p173_p9) target bundleno = 283 (0x11b), region = 32  ;;  %p204_p10 = scmp.lt.s32.totalorder (!%p173_p9), %s742_s5, 63 }
  0x11   : > { %s740_s23 = sshll.u32 (!%p173_p9), %s1104_s22, 8  ;;  %s784_s30 = sshll.u32 (!%p173_p9), %s991_s19, 8 }
  0x12   : > { %s1118_s29 = scalar_lea.vmem (!%p173_p9), [#allocation2], %s740_s23  ;;  %s623_s7 = scalar_lea.hbm (!%p173_p9), %s1374_s3, %s784_s30 }
  0x13   : > { %s624_s8 = sshll.u32 (!%p173_p9), %s1118_s29, 4  ;;  %s626_s9 = sshll.u32 (!%p173_p9), %s623_s7, 4  ;;  %s625_s8 = int_to_ptr.vmem [resolvable:$true] %s624_s8  ;;  %s627_s9 = int_to_ptr.hbm [resolvable:$true] %s626_s9 }
  0x14   : > { %s861_s11 = sshra.s32 (!%p173_p9), %s627_s9, 4  ;;  %s862_s11 = int_to_ptr.hbm [resolvable:$true] %s861_s11 }
  0x15   : > { %v246_v0 = vld [vmem:[%s1372_s1 + $0x20] sm:$0xf]  ;;  %vm348_vm0 = vcmask 1043456   ;;  %v245_v1 = vld [vmem:[%s1372_s1 + $0x18] sm:$0xff]  ;;  %v244_v2 = vld [vmem:[%s1372_s1 + $0x10] sm:$0xff]  ;;  %s1383_s5 = smov (!%p204_p10, %s742_s5), 63  ;;  %p868_p0 = scmp.lt.s32.totalorder %s862_s11, %s1374_s3 }
  0x16   : > { %744 = vmatpush.msk.msra.mxu0 %vm348_vm0, %v246_v0  ;;  %785 = vmatpush.msk.msra.mxu1 %vm348_vm0, %v246_v0  ;;  %v243_v3 = vld [vmem:[%s1372_s1 + $0x8] sm:$0xff]  ;;  %s743_s10 = sshll.u32 %s1383_s5, 3  ;;  %v242_v4 = vld [vmem:[%s1372_s1] sm:$0xff]  ;;  %vm251_vm1 = vcmask 293888   ;;  %s863_s12 = scalar_lea.hbm %s862_s11, 256 }
  0x17   : > { %786 = vmatpush.msk.msra.mxu2 %vm348_vm0, %v246_v0  ;;  %787 = vmatpush.msk.msra.mxu3 %vm348_vm0, %v246_v0  ;;  %s1037_s20 = scalar_lea.vmem %s1371_s0, %s743_s10  ;;  %v1110_v37 = vld [vmem:[%s1373_s2] ss:$0 sm:$0xff]  ;;  %s607_s10 = scalar_lea.sflag [#allocation3], %s1104_s22 }
  0x18   : > { %364 = vmatpush.msra.mxu0 %v245_v1  ;;  %788 = vmatpush.msra.mxu1 %v245_v1  ;;  %v210_v5 = vld [vmem:[%s1037_s20] sm:$0xff]  ;;  %v211_v8 = vld [vmem:[%s1037_s20 + $0x8] sm:$0xff]  ;;  %v212_v12 = vld [vmem:[%s1037_s20 + $0x10] sm:$0xff]  ;;  %p864_p11 = scmp.ne.s32.totalorder %s862_s11, %s863_s12 }
  0x19   : > { %789 = vmatpush.msra.mxu2 %v245_v1  ;;  %790 = vmatpush.msra.mxu3 %v245_v1  ;;  %v218_v6 = vld [vmem:[%s1037_s20 + $0x40] sm:$0xff]  ;;  %v219_v9 = vld [vmem:[%s1037_s20 + $0x48] sm:$0xff]  ;;  %v220_v13 = vld [vmem:[%s1037_s20 + $0x50] sm:$0xff] }
  0x1a   : > { %365 = vmatpush.msra.mxu0 %v244_v2  ;;  %791 = vmatpush.msra.mxu1 %v244_v2  ;;  %v226_v7 = vld [vmem:[%s1037_s20 + $0x80] sm:$0xff]  ;;  %v227_v10 = vld [vmem:[%s1037_s20 + $0x88] sm:$0xff]  ;;  %v228_v14 = vld [vmem:[%s1037_s20 + $0x90] sm:$0xff]  ;;  %p865_p12 = pnand %p864_p11, %p1008_p5 }
  0x1b   : > { %792 = vmatpush.msra.mxu2 %v244_v2  ;;  %793 = vmatpush.msra.mxu3 %v244_v2  ;;  %v234_v11 = vld [vmem:[%s1037_s20 + $0xc0] sm:$0xff]  ;;  %v235_v15 = vld [vmem:[%s1037_s20 + $0xc8] sm:$0xff]  ;;  %v213_v16 = vld [vmem:[%s1037_s20 + $0x18] sm:$0xff] }
  0x1c   : > { %366 = vmatpush.msra.mxu0 %v243_v3  ;;  %794 = vmatpush.msra.mxu1 %v243_v3  ;;  %v221_v17 = vld [vmem:[%s1037_s20 + $0x58] sm:$0xff]  ;;  %v236_v19 = vld [vmem:[%s1037_s20 + $0xd0] sm:$0xff]  ;;  %v214_v20 = vld [vmem:[%s1037_s20 + $0x20] sm:$0xff]  ;;  %p866_p13 = pneg %p865_p12 }
  0x1d   : > { %795 = vmatpush.msra.mxu2 %v243_v3  ;;  %796 = vmatpush.msra.mxu3 %v243_v3  ;;  %v229_v18 = vld [vmem:[%s1037_s20 + $0x98] sm:$0xff]  ;;  %v222_v21 = vld [vmem:[%s1037_s20 + $0x60] sm:$0xff]  ;;  %v215_v24 = vld [vmem:[%s1037_s20 + $0x28] sm:$0xff] }
  0x1e   : > { %367 = vmatpush.msra.mxu0 %v242_v4  ;;  %797 = vmatpush.msra.mxu1 %v242_v4  ;;  %v237_v22 = vld [vmem:[%s1037_s20 + $0xd8] sm:$0xff]  ;;  %v230_v23 = vld [vmem:[%s1037_s20 + $0xa0] sm:$0xff]  ;;  %v223_v25 = vld [vmem:[%s1037_s20 + $0x68] sm:$0xff] }
  0x1f   : > { %745 = vmatmul.msk.f32.vlgmr.msra.gmra.mxu0 %vm251_vm1, %v210_v5  ;;  %753 = vmatmul.msk.f32.vlgmr.msra.gmra.mxu1 %vm251_vm1, %v218_v6  ;;  %v238_v26 = vld [vmem:[%s1037_s20 + $0xe0] sm:$0xff]  ;;  %v231_v27 = vld [vmem:[%s1037_s20 + $0xa8] sm:$0xff]  ;;  %v216_v28 = vld [vmem:[%s1037_s20 + $0x30] sm:$0xff] }
  0x20   : > { %798 = vmatpush.msra.mxu2 %v242_v4  ;;  %799 = vmatpush.msra.mxu3 %v242_v4  ;;  %v224_v29 = vld [vmem:[%s1037_s20 + $0x70] sm:$0xff]  ;;  %v239_v30 = vld [vmem:[%s1037_s20 + $0xe8] sm:$0xff]  ;;  %v217_v32 = vld [vmem:[%s1037_s20 + $0x38] sm:$0xff] }
  0x21   : > { %761 = vmatmul.msk.f32.vlgmr.msra.gmra.mxu2 %vm251_vm1, %v226_v7  ;;  %769 = vmatmul.msk.f32.vlgmr.msra.gmra.mxu3 %vm251_vm1, %v234_v11  ;;  %v232_v31 = vld [vmem:[%s1037_s20 + $0xb0] sm:$0xff]  ;;  %v225_v33 = vld [vmem:[%s1037_s20 + $0x78] sm:$0xff] }
  0x22   : > { %v240_v34 = vld [vmem:[%s1037_s20 + $0xf0] sm:$0xff]  ;;  %v233_v35 = vld [vmem:[%s1037_s20 + $0xb8] sm:$0xff] }
  0x23   : > { %v241_v36 = vld [vmem:[%s1037_s20 + $0xf8] sm:$0xff]  ;;  %s867_s20 = scalar_lea.hbm %s1374_s3, 512 }
  0x24   : > { %p869_p1 = scmp.lt.s32.totalorder %s867_s20, %s863_s12 }
  0x26   : > { %p870_p2 = por %p869_p1, %p868_p0 }
  0x27   : > { %746 = vmatmul.msk.f32.gmra.mxu0 %vm251_vm1, %v211_v8  ;;  %754 = vmatmul.msk.f32.gmra.mxu1 %vm251_vm1, %v219_v9 }
  0x28   : > { %p871_p3 = pnand %p870_p2, %p866_p13 }
  0x29   : > { %762 = vmatmul.msk.f32.gmra.mxu2 %vm251_vm1, %v227_v10  ;;  %770 = vmatmul.msk.f32.gmra.mxu3 %vm251_vm1, %v235_v15 }
  0x2f   : > { %747 = vmatmul.msk.f32.gmra.mxu0 %vm251_vm1, %v212_v12  ;;  %755 = vmatmul.msk.f32.gmra.mxu1 %vm251_vm1, %v220_v13 }
  0x31   : > { %763 = vmatmul.msk.f32.gmra.mxu2 %vm251_vm1, %v228_v14  ;;  %771 = vmatmul.msk.f32.gmra.mxu3 %vm251_vm1, %v236_v19 }
  0x37   : > { %748 = vmatmul.msk.f32.gmra.mxu0 %vm251_vm1, %v213_v16  ;;  %756 = vmatmul.msk.f32.gmra.mxu1 %vm251_vm1, %v221_v17 }
  0x39   : > { %764 = vmatmul.msk.f32.gmra.mxu2 %vm251_vm1, %v229_v18  ;;  %772 = vmatmul.msk.f32.gmra.mxu3 %vm251_vm1, %v237_v22 }
  0x3f   : > { %749 = vmatmul.msk.f32.gmra.mxu0 %vm251_vm1, %v214_v20  ;;  %757 = vmatmul.msk.f32.gmra.mxu1 %vm251_vm1, %v222_v21 }
  0x41   : > { %765 = vmatmul.msk.f32.gmra.mxu2 %vm251_vm1, %v230_v23  ;;  %773 = vmatmul.msk.f32.gmra.mxu3 %vm251_vm1, %v238_v26 }
  0x47   : > { %750 = vmatmul.msk.f32.gmra.mxu0 %vm251_vm1, %v215_v24  ;;  %758 = vmatmul.msk.f32.gmra.mxu1 %vm251_vm1, %v223_v25 }
  0x49   : > { %766 = vmatmul.msk.f32.gmra.mxu2 %vm251_vm1, %v231_v27  ;;  %774 = vmatmul.msk.f32.gmra.mxu3 %vm251_vm1, %v239_v30 }
  0x4f   : > { %751 = vmatmul.msk.f32.gmra.mxu0 %vm251_vm1, %v216_v28  ;;  %759 = vmatmul.msk.f32.gmra.mxu1 %vm251_vm1, %v224_v29 }
  0x51   : > { %767 = vmatmul.msk.f32.gmra.mxu2 %vm251_vm1, %v232_v31  ;;  %775 = vmatmul.msk.f32.gmra.mxu3 %vm251_vm1, %v240_v34 }
  0x57   : > { %752 = vmatmul.msk.f32.gmra.mxu0 %vm251_vm1, %v217_v32  ;;  %760 = vmatmul.msk.f32.gmra.mxu1 %vm251_vm1, %v225_v33 }
  0x59   : > { %768 = vmatmul.msk.f32.gmra.mxu2 %vm251_vm1, %v233_v35  ;;  %776 = vmatmul.msk.f32.gmra.mxu3 %vm251_vm1, %v241_v36 }
  0x9c   : > { %v369_v38 = vpop.f32.mrf.mxu0  ;;  %v393_v39 = vpop.f32.mrf.mxu1 }
  0x9d   : > { %v1113_v40 = vadd.f32 %v1110_v37, %v369_v38  ;;  %v1116_v41 = vadd.f32 %v1110_v37, %v393_v39 }
  0x9f   : > { %465 = vst [vmem:[%s1118_s29] sm:$0xff] %v1113_v40  ;;  %v497_v17 = vmul.f32 %v1113_v40, %v1113_v40 }
  0xa0   : > { %473 = vst [vmem:[%s1118_s29 + $0x40] sm:$0xff] %v1116_v41 }
  0xa4   : > { %v372_v42 = vpop.f32.mrf.mxu0  ;;  %v396_v43 = vpop.f32.mrf.mxu1 }
  0xa5   : > { %v373_v44 = vadd.f32 %v1110_v37, %v372_v42  ;;  %v1126_v45 = vadd.f32 %v1110_v37, %v396_v43  ;;  %v417_v46 = vpop.f32.mrf.mxu2  ;;  %v441_v53 = vpop.f32.mrf.mxu3 }
  0xa6   : > { %v1129_v47 = vadd.f32 %v1110_v37, %v417_v46  ;;  %v1144_v55 = vadd.f32 %v1110_v37, %v441_v53 }
  0xa7   : > { %466 = vst [vmem:[%s1118_s29 + $0x8] sm:$0xff] %v373_v44  ;;  %v498_v16 = vmul.f32 %v373_v44, %v373_v44  ;;  %v529_v18 = vadd.f32 %v373_v44, %v1113_v40 }
  0xa8   : > { %474 = vst [vmem:[%s1118_s29 + $0x48] sm:$0xff] %v1126_v45 }
  0xa9   : > { %481 = vst [vmem:[%s1118_s29 + $0x80] sm:$0xff] %v1129_v47  ;;  %v566_v20 = vadd.f32 %v498_v16, %v497_v17 }
  0xaa   : > { %489 = vst [vmem:[%s1118_s29 + $0xc0] sm:$0xff] %v1144_v55 }
  0xac   : > { %v375_v48 = vpop.f32.mrf.mxu0  ;;  %v399_v49 = vpop.f32.mrf.mxu1 }
  0xad   : > { %v376_v50 = vadd.f32 %v1110_v37, %v375_v48  ;;  %v1138_v51 = vadd.f32 %v1110_v37, %v399_v49  ;;  %v420_v52 = vpop.f32.mrf.mxu2  ;;  %v444_v61 = vpop.f32.mrf.mxu3 }
  0xae   : > { %v1141_v54 = vadd.f32 %v1110_v37, %v420_v52  ;;  %v1161_v63 = vadd.f32 %v1110_v37, %v444_v61  ;;  %v505_v61 = vmul.f32 %v1116_v41, %v1116_v41 }
  0xaf   : > { %467 = vst [vmem:[%s1118_s29 + $0x10] sm:$0xff] %v376_v50  ;;  %v499_v19 = vmul.f32 %v376_v50, %v376_v50  ;;  %v530_v23 = vadd.f32 %v529_v18, %v376_v50 }
  0xb0   : > { %475 = vst [vmem:[%s1118_s29 + $0x50] sm:$0xff] %v1138_v51 }
  0xb1   : > { %482 = vst [vmem:[%s1118_s29 + $0x88] sm:$0xff] %v1141_v54  ;;  %v567_v31 = vadd.f32 %v566_v20, %v499_v19 }
  0xb2   : > { %490 = vst [vmem:[%s1118_s29 + $0xc8] sm:$0xff] %v1161_v63 }
  0xb4   : > { %v378_v56 = vpop.f32.mrf.mxu0  ;;  %v402_v57 = vpop.f32.mrf.mxu1 }
  0xb5   : > { %v379_v58 = vadd.f32 %v1110_v37, %v378_v56  ;;  %v1155_v59 = vadd.f32 %v1110_v37, %v402_v57  ;;  %v423_v60 = vpop.f32.mrf.mxu2  ;;  %v447_v5 = vpop.f32.mrf.mxu3 }
  0xb6   : > { %v1158_v62 = vadd.f32 %v1110_v37, %v423_v60  ;;  %v1178_v7 = vadd.f32 %v1110_v37, %v447_v5 }
  0xb7   : > { %468 = vst [vmem:[%s1118_s29 + $0x18] sm:$0xff] %v379_v58  ;;  %v500_v24 = vmul.f32 %v379_v58, %v379_v58  ;;  %v531_v32 = vadd.f32 %v530_v23, %v379_v58 }
  0xb8   : > { %476 = vst [vmem:[%s1118_s29 + $0x58] sm:$0xff] %v1155_v59 }
  0xb9   : > { %483 = vst [vmem:[%s1118_s29 + $0x90] sm:$0xff] %v1158_v62  ;;  %v568_v34 = vadd.f32 %v567_v31, %v500_v24 }
  0xba   : > { %491 = vst [vmem:[%s1118_s29 + $0xd0] sm:$0xff] %v1178_v7 }
  0xbc   : > { %v381_v0 = vpop.f32.mrf.mxu0  ;;  %v405_v1 = vpop.f32.mrf.mxu1 }
  0xbd   : > { %v382_v2 = vadd.f32 %v1110_v37, %v381_v0  ;;  %v1172_v3 = vadd.f32 %v1110_v37, %v405_v1  ;;  %v426_v4 = vpop.f32.mrf.mxu2  ;;  %v450_v13 = vpop.f32.mrf.mxu3 }
  0xbe   : > { %v1175_v6 = vadd.f32 %v1110_v37, %v426_v4  ;;  %v1195_v15 = vadd.f32 %v1110_v37, %v450_v13 }
  0xbf   : > { %469 = vst [vmem:[%s1118_s29 + $0x20] sm:$0xff] %v382_v2  ;;  %v501_v33 = vmul.f32 %v382_v2, %v382_v2  ;;  %v532_v35 = vadd.f32 %v531_v32, %v382_v2  ;;  %v506_v2 = vmul.f32 %v1126_v45, %v1126_v45 }
  0xc0   : > { %477 = vst [vmem:[%s1118_s29 + $0x60] sm:$0xff] %v1172_v3 }
  0xc1   : > { %484 = vst [vmem:[%s1118_s29 + $0x98] sm:$0xff] %v1175_v6  ;;  %v569_v38 = vadd.f32 %v568_v34, %v501_v33 }
  0xc2   : > { %492 = vst [vmem:[%s1118_s29 + $0xd8] sm:$0xff] %v1195_v15 }
  0xc4   : > { %v384_v8 = vpop.f32.mrf.mxu0  ;;  %v408_v9 = vpop.f32.mrf.mxu1 }
  0xc5   : > { %v385_v10 = vadd.f32 %v1110_v37, %v384_v8  ;;  %v1189_v11 = vadd.f32 %v1110_v37, %v408_v9  ;;  %v429_v12 = vpop.f32.mrf.mxu2  ;;  %v453_v28 = vpop.f32.mrf.mxu3  ;;  %v507_v8 = vmul.f32 %v1138_v51, %v1138_v51 }
  0xc6   : > { %v1192_v14 = vadd.f32 %v1110_v37, %v429_v12  ;;  %v1215_v30 = vadd.f32 %v1110_v37, %v453_v28 }
  0xc7   : > { %470 = vst [vmem:[%s1118_s29 + $0x28] sm:$0xff] %v385_v10  ;;  %v502_v36 = vmul.f32 %v385_v10, %v385_v10  ;;  %v533_v39 = vadd.f32 %v532_v35, %v385_v10 }
  0xc8   : > { %478 = vst [vmem:[%s1118_s29 + $0x68] sm:$0xff] %v1189_v11 }
  0xc9   : > { %485 = vst [vmem:[%s1118_s29 + $0xa0] sm:$0xff] %v1192_v14  ;;  %v570_v44 = vadd.f32 %v569_v38, %v502_v36 }
  0xca   : > { %493 = vst [vmem:[%s1118_s29 + $0xe0] sm:$0xff] %v1215_v30 }
  0xcc   : > { %v387_v21 = vpop.f32.mrf.mxu0  ;;  %v411_v22 = vpop.f32.mrf.mxu1 }
  0xcd   : > { %v388_v25 = vadd.f32 %v1110_v37, %v387_v21  ;;  %v1209_v26 = vadd.f32 %v1110_v37, %v411_v22  ;;  %v432_v27 = vpop.f32.mrf.mxu2  ;;  %v456_v52 = vpop.f32.mrf.mxu3 }
  0xce   : > { %v1212_v29 = vadd.f32 %v1110_v37, %v432_v27  ;;  %v1230_v56 = vadd.f32 %v1110_v37, %v456_v52 }
  0xcf   : > { %471 = vst [vmem:[%s1118_s29 + $0x30] sm:$0xff] %v388_v25  ;;  %v503_v40 = vmul.f32 %v388_v25, %v388_v25  ;;  %v534_v46 = vadd.f32 %v533_v39, %v388_v25  ;;  %v511_v24 = vmul.f32 %v1209_v26, %v1209_v26 }
  0xd0   : > { %479 = vst [vmem:[%s1118_s29 + $0x70] sm:$0xff] %v1209_v26 }
  0xd1   : > { %486 = vst [vmem:[%s1118_s29 + $0xa8] sm:$0xff] %v1212_v29  ;;  %v571_v57 = vadd.f32 %v570_v44, %v503_v40 }
  0xd2   : > { %494 = vst [vmem:[%s1118_s29 + $0xe8] sm:$0xff] %v1230_v56 }
  0xd4   : > { %v390_v42 = vpop.f32.mrf.mxu0  ;;  %v414_v43 = vpop.f32.mrf.mxu1 }
  0xd5   : > { %v391_v48 = vadd.f32 %v1110_v37, %v390_v42  ;;  %v415_v49 = vadd.f32 %v1110_v37, %v414_v43  ;;  %v435_v50 = vpop.f32.mrf.mxu2  ;;  %v459_v12 = vpop.f32.mrf.mxu3 }
  0xd6   : > { %v1227_v53 = vadd.f32 %v1110_v37, %v435_v50  ;;  %v1252_v16 = vadd.f32 %v1110_v37, %v459_v12 }
  0xd7   : > { %472 = vst [vmem:[%s1118_s29 + $0x38] sm:$0xff] %v391_v48  ;;  %v504_v58 = vmul.f32 %v391_v48, %v391_v48  ;;  %v535_v60 = vadd.f32 %v534_v46, %v391_v48 }
  0xd8   : > { %480 = vst [vmem:[%s1118_s29 + $0x78] sm:$0xff] %v415_v49 }
  0xd9   : > { %v536_v0 = vadd.f32 %v535_v60, %v1116_v41  ;;  %v572_v1 = vadd.f32 %v571_v57, %v504_v58  ;;  %487 = vst [vmem:[%s1118_s29 + $0xb0] sm:$0xff] %v1227_v53 }
  0xda   : > { %495 = vst [vmem:[%s1118_s29 + $0xf0] sm:$0xff] %v1252_v16 }
  0xdb   : > { %v537_v4 = vadd.f32 %v536_v0, %v1126_v45  ;;  %v573_v5 = vadd.f32 %v572_v1, %v505_v61  ;;  %v508_v45 = vmul.f32 %v1155_v59, %v1155_v59 }
  0xdd   : > { %v574_v9 = vadd.f32 %v573_v5, %v506_v2  ;;  %v538_v41 = vadd.f32 %v537_v4, %v1138_v51  ;;  %v438_v10 = vpop.f32.mrf.mxu2  ;;  %v509_v51 = vmul.f32 %v1172_v3, %v1172_v3  ;;  %v462_v27 = vpop.f32.mrf.mxu3 }
  0xde   : > { %v1249_v13 = vadd.f32 %v1110_v37, %v438_v10  ;;  %v1275_v28 = vadd.f32 %v1110_v37, %v462_v27 }
  0xdf   : > { %v539_v17 = vadd.f32 %v538_v41, %v1155_v59  ;;  %v575_v18 = vadd.f32 %v574_v9, %v507_v8  ;;  %v510_v59 = vmul.f32 %v1189_v11, %v1189_v11 }
  0xe0   : > { %488 = vst [vmem:[%s1118_s29 + $0xb8] sm:$0xff] %v1249_v13 }
  0xe1   : > { %v540_v19 = vadd.f32 %v539_v17, %v1172_v3  ;;  %v576_v20 = vadd.f32 %v575_v18, %v508_v45  ;;  %v512_v3 = vmul.f32 %v415_v49, %v415_v49  ;;  %496 = vst [vmem:[%s1118_s29 + $0xf8] sm:$0xff] %v1275_v28 }
  0xe3   : > { %v541_v21 = vadd.f32 %v540_v19, %v1189_v11  ;;  %v577_v22 = vadd.f32 %v576_v20, %v509_v51  ;;  %v513_v11 = vmul.f32 %v1129_v47, %v1129_v47 }
  0xe5   : > { %v578_v23 = vadd.f32 %v577_v22, %v510_v59  ;;  %v542_v25 = vadd.f32 %v541_v21, %v1209_v26 }
  0xe7   : > { %v579_v31 = vadd.f32 %v578_v23, %v511_v24  ;;  %v543_v32 = vadd.f32 %v542_v25, %v415_v49 }
  0xe9   : > { %v544_v33 = vadd.f32 %v543_v32, %v1129_v47  ;;  %v580_v34 = vadd.f32 %v579_v31, %v512_v3 }
  0xea   : > { %874 = shalt.err (!%p871_p3)
}
  0xeb   : > { %s943_s28 = smov 128   ;;  %s944_s29 = smov 8   ;;  %v514_v37 = vmul.f32 %v1141_v54, %v1141_v54  ;;  %v545_v47 = vadd.f32 %v544_v33, %v1141_v54  ;;  %v581_v26 = vadd.f32 %v580_v34, %v513_v11  ;;  %v515_v35 = vmul.f32 %v1158_v62, %v1158_v62 }
  0xec   : > { %800 = dma.vmem_to_hbm [thread:$0]  (%p1008_p5), %s625_s8, 4096, %s627_s9, %s607_s10, %s943_s28, %s943_s28, %s944_s29   ;;  %v516_v39 = vmul.f32 %v1175_v6, %v1175_v6  ;;  %v517_v43 = vmul.f32 %v1192_v14, %v1192_v14  ;;  %v518_v54 = vmul.f32 %v1212_v29, %v1212_v29  ;;  %v524_v5 = vmul.f32 %v1195_v15, %v1195_v15 }
  0xed   : > { %v582_v36 = vadd.f32 %v581_v26, %v514_v37  ;;  %v546_v38 = vadd.f32 %v545_v47, %v1158_v62  ;;  %v519_v62 = vmul.f32 %v1227_v53, %v1227_v53  ;;  %v527_v45 = vmul.f32 %v1252_v16, %v1252_v16  ;;  %s741_s30 = sshll.u32 %s1104_s22, 1  ;;  %s781_s5 = sshll.u32 %s991_s19, 1 }
  0xee   : > { %v528_v17 = vmul.f32 %v1275_v28, %v1275_v28  ;;  %s639_s8 = scalar_lea.hbm %s1375_s4, %s781_s5  ;;  %s202_s9 = scalar_lea.vmem [#allocation4], %s741_s30  ;;  %vm603_vm2 = vcmask 1040384  }
  0xef   : > { %v547_v40 = vadd.f32 %v546_v38, %v1175_v6  ;;  %v583_v42 = vadd.f32 %v582_v36, %v515_v35  ;;  %v520_v6 = vmul.f32 %v1249_v13, %v1249_v13  ;;  %s641_s10 = sshll.u32 %s202_s9, 4  ;;  %s643_s11 = sshll.u32 %s639_s8, 4  ;;  %s642_s10 = int_to_ptr.vmem [resolvable:$true] %s641_s10  ;;  %s644_s11 = int_to_ptr.hbm [resolvable:$true] %s643_s11 }
  0xf0   : > { %s612_s19 = scalar_lea.sflag [#allocation5], %s1104_s22  ;;  %s889_s12 = sshra.s32 %s644_s11, 4  ;;  %s890_s12 = int_to_ptr.hbm [resolvable:$true] %s889_s12 }
  0xf1   : > { %v548_v44 = vadd.f32 %v547_v40, %v1192_v14  ;;  %v584_v46 = vadd.f32 %v583_v42, %v516_v39  ;;  %v521_v14 = vmul.f32 %v1144_v55, %v1144_v55  ;;  %s891_s13 = scalar_lea.hbm %s890_s12, 2  ;;  %s895_s23 = scalar_lea.hbm %s1375_s4, 4 }
  0xf2   : > { %p892_p4 = scmp.ne.s32.totalorder %s890_s12, %s891_s13  ;;  %p896_p9 = scmp.lt.s32.totalorder %s890_s12, %s1375_s4 }
  0xf3   : > { %v549_v48 = vadd.f32 %v548_v44, %v1212_v29  ;;  %v585_v49 = vadd.f32 %v584_v46, %v517_v43  ;;  %v522_v29 = vmul.f32 %v1161_v63, %v1161_v63  ;;  %p897_p10 = scmp.lt.s32.totalorder %s895_s23, %s891_s13 }
  0xf4   : > { %p893_p7 = pnand %p892_p4, %p1008_p5 }
  0xf5   : > { %v586_v50 = vadd.f32 %v585_v49, %v518_v54  ;;  %v550_v52 = vadd.f32 %v549_v48, %v1227_v53  ;;  %v523_v53 = vmul.f32 %v1178_v7, %v1178_v7  ;;  %p898_p11 = por %p897_p10, %p896_p9 }
  0xf6   : > { %p894_p8 = pneg %p893_p7 }
  0xf7   : > { %v587_v57 = vadd.f32 %v586_v50, %v519_v62  ;;  %v551_v58 = vadd.f32 %v550_v52, %v1249_v13 }
  0xf8   : > { %p899_p12 = pnand %p898_p11, %p894_p8 }
  0xf9   : > { %v552_v60 = vadd.f32 %v551_v58, %v1144_v55  ;;  %v588_v61 = vadd.f32 %v587_v57, %v520_v6  ;;  %v525_v55 = vmul.f32 %v1215_v30, %v1215_v30 }
  0xfb   : > { %v553_v0 = vadd.f32 %v552_v60, %v1161_v63  ;;  %v589_v1 = vadd.f32 %v588_v61, %v521_v14  ;;  %v526_v63 = vmul.f32 %v1230_v56, %v1230_v56 }
  0xfd   : > { %v590_v2 = vadd.f32 %v589_v1, %v522_v29  ;;  %v554_v4 = vadd.f32 %v553_v0, %v1178_v7 }
  0xff   : > { %v555_v8 = vadd.f32 %v554_v4, %v1195_v15  ;;  %v591_v9 = vadd.f32 %v590_v2, %v523_v53 }
 0x101   : > { %v556_v41 = vadd.f32 %v555_v8, %v1215_v30  ;;  %v592_v10 = vadd.f32 %v591_v9, %v524_v5 }
 0x103   : > { %v557_v12 = vadd.f32 %v556_v41, %v1230_v56  ;;  %v593_v7 = vadd.f32 %v592_v10, %v525_v55 }
 0x105   : > { %v594_v13 = vadd.f32 %v593_v7, %v526_v63  ;;  %v558_v15 = vadd.f32 %v557_v12, %v1252_v16 }
 0x107   : > { %v595_v18 = vadd.f32 %v594_v13, %v527_v45  ;;  %v559_v30 = vadd.f32 %v558_v15, %v1275_v28 }
 0x109   : > { %v560_v51 = vrot.slane %v559_v30, 4  ;;  %v596_v19 = vadd.f32 %v595_v18, %v528_v17 }
 0x10b   : > { %v561_v20 = vadd.f32 %v560_v51, %v559_v30  ;;  %v597_v59 = vrot.slane %v596_v19, 4 }
 0x10d   : > { %v562_v21 = vrot.slane %v561_v20, 2  ;;  %v598_v22 = vadd.f32 %v597_v59, %v596_v19 }
 0x10f   : > { %v563_v56 = vadd.f32 %v562_v21, %v561_v20  ;;  %v599_v23 = vrot.slane %v598_v22, 2 }
 0x111   : > { %v564_v16 = vrot.slane %v563_v56, 1  ;;  %v600_v24 = vadd.f32 %v599_v23, %v598_v22 }
 0x113   : > { %v601_v25 = vrot.slane %v600_v24, 1  ;;  %v565_v3 = vadd.f32 %v564_v16, %v563_v56 }
 0x115   : > { %v602_v27 = vadd.f32 %v601_v25, %v600_v24 }
 0x117   : > { %v604_v28 = vsel %vm603_vm2, %v565_v3, %v602_v27 }
 0x118   : > { %605 = vst [vmem:[%s202_s9] sm:$0x3] %v604_v28 }
 0x119   : > { %902 = shalt.err (!%p899_p12)
}
 0x11a   : > { %801 = dma.vmem_to_hbm [thread:$0]  (%p1008_p5), %s642_s10, 32, %s644_s11, %s612_s19  }
 0x11b PF: > { %p811_p13 = scmp.ge.s32.totalorder %s941_s18, 2  ;;  %s655_s22 = sand.u32 1, %s929_s15  }
 0x11c   : > { %s656_s29 = scalar_lea.sflag [#allocation3], %s655_s22 }
 0x11d   : > { %p805_p0 = pnand %p811_p13, %p1012_p6 }
 0x11f   : > { %p806_p1 = pneg %p805_p0 }
 0x121   : > { %920 = dma.done.wait (%p806_p1), %s656_s29, 4096  }
 0x122   : > { %922 = vsyncadd (%p806_p1), %s656_s29, 4294963200  ;;  %s666_s30 = scalar_lea.sflag [#allocation5], %s655_s22 }
 0x123   : > { %924 = dma.done.wait (%p806_p1), %s666_s30, 32  }
 0x124   : > { %926 = vsyncadd (%p806_p1), %s666_s30, 4294967264  ;;  %p18_p5 = scmp.ge.s32.totalorder %s995_s21, 4   ;;  %s1378_s15 = smov %s933_s16 }
 0x125   : > { %s1379_s16 = smov %s937_s17  ;;  %s1380_s17 = smov %s1006_s24 }
 0x126   : > { %s1381_s18 = smov %s995_s21  ;;  %20 = sbr.rel (!%p18_p5) target bundleno = 5 (0x5), region = 84 }
 0x12b   :  { %672 = vsyncpa [#allocation3], 1 }
 0x12c   :  { %674 = vsyncpa [#allocation3 + $0x1], 1 }
 0x12d   :  { %675 = vsyncpa [#allocation5], 1 }
 0x12e   :  { %677 = vsyncpa [#allocation5 + $0x1], 1 }

</bundles_post_ra>
